<compile_context>
chip_gen: v5e
topology: v5e:2x2
jax: 0.10.0
libtpu: 0.0.40
codegen_flags: <defaults>
</compile_context>

<pallas_src>
import functools

import numpy as np

import jax
import jax.numpy as jnp
from jax.experimental import pallas as pl
from jax.experimental.pallas import tpu as pltpu


# ---------------------------------------------------------------------------
# VMEM-budget-driven tiling
# ---------------------------------------------------------------------------

_N_DATA_SLABS = 4       # 2 data inputs + 2 data outputs, each a (C, tile) f32 slab
_N_BUFFERS = 2          # Pallas double-buffers every pipelined BlockSpec
_ABS_MAX_TILE = 32768   # lane cap: bounds per-step latency / ragged-tile waste


def _vmem_capacity_bytes():
    """Physical VMEM of the current TPU generation (fallback: v7x per-core)."""
    try:
        info = pltpu.get_tpu_info()
        cap = getattr(info, "vmem_capacity_bytes", None)
        if cap:
            return int(cap)
    except Exception:
        pass
    return 64 << 20  # conservative: smallest (v7x per-TensorCore) VMEM


def _tile_hw(hw, c):
    """Largest 128-multiple lane tile whose double-buffered slabs fit ~half VMEM."""
    budget = _vmem_capacity_bytes() // 2          # ~64 MiB v5e/v6e, ~32 MiB v7x
    per_lane_bytes = _N_DATA_SLABS * _N_BUFFERS * c * 4
    tile = min(budget // per_lane_bytes, _ABS_MAX_TILE)
    tile = max(128, (tile // 128) * 128)
    return hw if hw <= tile else tile             # full-extent block is always legal


def _vmem_limit_bytes(c, tile):
    work = _N_DATA_SLABS * _N_BUFFERS * c * tile * 4   # pipelined data slabs
    work += 4 * (c * c + c) * 4                        # resident weights + biases
    limit = max(int(work * 1.3), 32 << 20)             # headroom, never below ~default
    return min(limit, int(_vmem_capacity_bytes() * 0.9))


# ---------------------------------------------------------------------------
# Pallas kernels
# ---------------------------------------------------------------------------

def _ri_kernel(xr_ref, xi_ref, wr_ref, br_ref, wi_ref, bi_ref, yr_ref, yi_ref):
    # Two independent 1x1 convs (channel matmuls) + bias + ReLU on real / imag.
    yr = jnp.dot(xr_ref[...].T @ jnp.eye(1, dtype=jnp.float32) if False else wr_ref[...],
                 xr_ref[...], preferred_element_type=jnp.float32) + br_ref[...]
    yi = jnp.dot(wi_ref[...], xi_ref[...],
                 preferred_element_type=jnp.float32) + bi_ref[...]
    yr_ref[...] = jnp.maximum(yr, 0.0)
    yi_ref[...] = jnp.maximum(yi, 0.0)


# (keep _ri_kernel simple / free of the dead branch above)
def _ri_kernel(xr_ref, xi_ref, wr_ref, br_ref, wi_ref, bi_ref, yr_ref, yi_ref):  # noqa: F811
    yr = jnp.dot(wr_ref[...], xr_ref[...],
                 preferred_element_type=jnp.float32) + br_ref[...]
    yi = jnp.dot(wi_ref[...], xi_ref[...],
                 preferred_element_type=jnp.float32) + bi_ref[...]
    yr_ref[...] = jnp.maximum(yr, 0.0)
    yi_ref[...] = jnp.maximum(yi, 0.0)


def _ap_kernel_fused(xr_ref, xi_ref, wa_ref, ba_ref, wp_ref, bp_ref, yr_ref, yi_ref):
    # amp/phase extracted in-kernel from the FFT real/imag tiles (rides VPU/EUP
    # slack of a memory-bound stage), then 1x1 conv + bias + ReLU and
    # amp*cos / amp*sin reconstruction.
    xr = xr_ref[...]
    xi = xi_ref[...]
    amp = jnp.sqrt(xr * xr + xi * xi)          # == |z|
    pha = jnp.arctan2(xi, xr)                  # == angle(z)
    a = jnp.maximum(
        jnp.dot(wa_ref[...], amp, preferred_element_type=jnp.float32) + ba_ref[...], 0.0)
    p = jnp.maximum(
        jnp.dot(wp_ref[...], pha, preferred_element_type=jnp.float32) + bp_ref[...], 0.0)
    yr_ref[...] = a * jnp.cos(p)
    yi_ref[...] = a * jnp.sin(p)


def _ap_kernel_precomputed(amp_ref, pha_ref, wa_ref, ba_ref, wp_ref, bp_ref,
                           yr_ref, yi_ref):
    # Fallback when Mosaic rejects atan2: amp/phase come from the JAX wrapper.
    a = jnp.maximum(
        jnp.dot(wa_ref[...], amp_ref[...], preferred_element_type=jnp.float32) + ba_ref[...], 0.0)
    p = jnp.maximum(
        jnp.dot(wp_ref[...], pha_ref[...], preferred_element_type=jnp.float32) + bp_ref[...], 0.0)
    yr_ref[...] = a * jnp.cos(p)
    yi_ref[...] = a * jnp.sin(p)


@functools.lru_cache(maxsize=None)
def _atan2_lowers_in_mosaic():
    """Compile + run a tiny atan2 kernel once to check Mosaic support.

    Uses numpy inputs so the probe executes eagerly even if first called while
    tracing the main forward under jit.
    """
    def k(a_ref, b_ref, o_ref):
        o_ref[...] = jnp.arctan2(a_ref[...], b_ref[...])
    try:
        f = pl.pallas_call(k, out_shape=jax.ShapeDtypeStruct((8, 128), jnp.float32))
        ones = np.ones((8, 128), np.float32)
        jax.block_until_ready(jax.jit(f)(ones, ones))
        return True
    except Exception:
        return False


# ---------------------------------------------------------------------------
# pallas_call wrapper for one channel-mixing stage
# ---------------------------------------------------------------------------

def _stage_call(kernel, xa, xb, w1, b1, w2, b2, *, transcendentals_per_elem):
    """Per-pixel channel-mixing stage on (N, C, HW) slabs, tiled over (N, HW)."""
    N, C, HW = xa.shape

    tile = _tile_hw(HW, C)
    if N == 1 and tile >= HW and HW >= 2 * 128:
        # v7x megacore: guarantee >= 2 steps along the parallel grid axes.
        half = (HW + 1) // 2
        tile = max(128, ((half + 127) // 128) * 128)
    grid = (N, pl.cdiv(HW, tile))

    # N lives in the grid (squeezed out of the kernel view); C on sublanes;
    # a lane-dense HW tile on lanes.  Weights / biases stay resident.
    data_spec = pl.BlockSpec((None, C, tile), lambda n, p: (n, 0, p))
    w_spec = pl.BlockSpec((C, C), lambda n, p: (0, 0))
    b_spec = pl.BlockSpec((C, 1), lambda n, p: (0, 0))

    cost = pl.CostEstimate(
        flops=int(N * HW * (4 * C * C + 8 * C)),
        transcendentals=int(transcendentals_per_elem * N * C * HW),
        bytes_accessed=int(16 * N * C * HW + 8 * C * C + 8 * C),
    )

    return pl.pallas_call(
        kernel,
        grid=grid,
        in_specs=[data_spec, data_spec, w_spec, b_spec, w_spec, b_spec],
        out_specs=[data_spec, data_spec],
        out_shape=(jax.ShapeDtypeStruct((N, C, HW), jnp.float32),
                   jax.ShapeDtypeStruct((N, C, HW), jnp.float32)),
        compiler_params=pltpu.CompilerParams(
            dimension_semantics=("parallel", "parallel"),
            vmem_limit_bytes=_vmem_limit_bytes(C, tile)),
        cost_estimate=cost,
    )(xa, xb, w1, b1, w2, b2)


# ---------------------------------------------------------------------------
# model forward
# ---------------------------------------------------------------------------

def conv_fre_branch(x, params):
    """x: (N, C, H, W) float32 (NCHW, like PyTorch). Returns (N, C, H, W) float32."""
    N, C, H, W = x.shape
    HW = H * W

    flat = lambda a: a.reshape(N, C, HW)       # free reshape, no transpose
    unflat = lambda a: a.reshape(N, C, H, W)   # free reshape, no transpose

    ap_in_kernel = _atan2_lowers_in_mosaic()

    # ---------------- Fre_RI ----------------
    X = jnp.fft.fft2(x.astype(jnp.float32), axes=(-2, -1))   # complex64, norm='backward'
    yr, yi = _stage_call(_ri_kernel,
                         flat(jnp.real(X)), flat(jnp.imag(X)),
                         params["w_real"], params["b_real"],
                         params["w_imag"], params["b_imag"],
                         transcendentals_per_elem=0)
    z = jnp.fft.ifft2(jax.lax.complex(unflat(yr), unflat(yi)), axes=(-2, -1))
    out1 = jnp.abs(z)   # |ifft| (separate elementwise pass; out1 feeds the next fft2)

    # ---------------- Fre_AP ----------------
    X2 = jnp.fft.fft2(out1, axes=(-2, -1))
    if ap_in_kernel:
        # sqrt / atan2 / cos / sin all happen inside the Pallas kernel.
        a_in, b_in = flat(jnp.real(X2)), flat(jnp.imag(X2))
        ap_kernel, n_trans = _ap_kernel_fused, 4
    else:
        # TODO(synk): Mosaic rejected atan2 on this jaxlib; amplitude/phase
        # extraction falls back to plain JAX next to the FFT (same numerics).
        a_in, b_in = flat(jnp.abs(X2)), flat(jnp.angle(X2))
        ap_kernel, n_trans = _ap_kernel_precomputed, 2
    yr2, yi2 = _stage_call(ap_kernel, a_in, b_in,
                           params["w_amp"], params["b_amp"],
                           params["w_pha"], params["b_pha"],
                           transcendentals_per_elem=n_trans)
    z2 = jnp.fft.ifft2(jax.lax.complex(unflat(yr2), unflat(yi2)), axes=(-2, -1))
    return jnp.abs(z2)


# ---------------------------------------------------------------------------
# params / main
# ---------------------------------------------------------------------------

def init_params(key, C):
    # Conv2d(C, C, kernel_size=1) weights: (C_out, C_in, 1, 1) -> stored as (C, C);
    # biases stored as (C, 1) for lane-broadcast inside the kernels.
    ks = jax.random.split(key, 8)
    bound = 1.0 / (C ** 0.5)

    def u(k, shape):
        return jax.random.uniform(k, shape, jnp.float32, -bound, bound)

    return dict(
        w_real=u(ks[0], (C, C)), b_real=u(ks[1], (C, 1)),
        w_imag=u(ks[2], (C, C)), b_imag=u(ks[3], (C, 1)),
        w_amp=u(ks[4], (C, C)),  b_amp=u(ks[5], (C, 1)),
        w_pha=u(ks[6], (C, C)),  b_pha=u(ks[7], (C, 1)),
    )


if __name__ == "__main__":
    key = jax.random.PRNGKey(0)
    kx, kp = jax.random.split(key)

    N, C, H, W = 2, 4, 16, 16
    x = jax.random.normal(kx, (N, C, H, W), dtype=jnp.float32)
    params = init_params(kp, C)

    # Run the atan2 feature probe once, outside any trace.
    _atan2_lowers_in_mosaic()

    out = jax.jit(conv_fre_branch)(x, params)
    out = jax.block_until_ready(out)

    assert out.shape == (N, C, H, W), out.shape
    assert out.dtype == jnp.float32, out.dtype
    assert bool(jnp.all(jnp.isfinite(out)))
    print("KERNEL_OK")
</pallas_src>

<mosaic_0001>
module attributes {stable_mosaic.version = 11 : i64} {
  func.func @k(%arg0: memref<8x128xf32, #tpu.memory_space<vmem>>, %arg1: memref<8x128xf32, #tpu.memory_space<vmem>>, %arg2: memref<8x128xf32, #tpu.memory_space<vmem>>) attributes {dimension_semantics = [], scalar_prefetch = 0 : i64, scratch_operands = 0 : i64, tpu.core_type = #tpu.core_type<tc>} {
    %c0 = arith.constant 0 : index
    %c0_0 = arith.constant 0 : index
    %0 = vector.load %arg0[%c0, %c0_0] : memref<8x128xf32, #tpu.memory_space<vmem>>, vector<8x128xf32>
    %c0_1 = arith.constant 0 : index
    %c0_2 = arith.constant 0 : index
    %1 = vector.load %arg1[%c0_1, %c0_2] : memref<8x128xf32, #tpu.memory_space<vmem>>, vector<8x128xf32>
    %2 = math.atan2 %0, %1 : vector<8x128xf32>
    %c0_3 = arith.constant 0 : index
    %c0_4 = arith.constant 0 : index
    %3 = vector.load %arg2[%c0_3, %c0_4] : memref<8x128xf32, #tpu.memory_space<vmem>>, vector<8x128xf32>
    tpu.vector_store %arg2[%c0_3, %c0_4], %2 {strides = array<i32>} : memref<8x128xf32, #tpu.memory_space<vmem>>, vector<8x128xf32>,
    return
  }
}

module attributes {stable_mosaic.version = 11 : i64} {
  func.func @_ri_kernel(%arg0: i32, %arg1: i32, %arg2: memref<1x4x256xf32, #tpu.memory_space<vmem>>, %arg3: memref<1x4x256xf32, #tpu.memory_space<vmem>>, %arg4: memref<4x4xf32, #tpu.memory_space<vmem>>, %arg5: memref<4x1xf32, #tpu.memory_space<vmem>>, %arg6: memref<4x4xf32, #tpu.memory_space<vmem>>, %arg7: memref<4x1xf32, #tpu.memory_space<vmem>>, %arg8: memref<1x4x256xf32, #tpu.memory_space<vmem>>, %arg9: memref<1x4x256xf32, #tpu.memory_space<vmem>>) attributes {dimension_semantics = [#tpu.dimension_semantics<parallel>, #tpu.dimension_semantics<parallel>], iteration_bounds = array<i64: 2, 1>, scalar_prefetch = 0 : i64, scratch_operands = 0 : i64, tpu.core_type = #tpu.core_type<tc>, window_params = [{transform_indices = @transform_0, window_bounds = array<i64: 1, 4, 256>}, {transform_indices = @transform_1, window_bounds = array<i64: 1, 4, 256>}, {pipeline_mode = #tpu.pipeline_mode<synchronous>, transform_indices = @transform_2, window_bounds = array<i64: 4, 4>}, {pipeline_mode = #tpu.pipeline_mode<synchronous>, transform_indices = @transform_3, window_bounds = array<i64: 4, 1>}, {pipeline_mode = #tpu.pipeline_mode<synchronous>, transform_indices = @transform_4, window_bounds = array<i64: 4, 4>}, {pipeline_mode = #tpu.pipeline_mode<synchronous>, transform_indices = @transform_5, window_bounds = array<i64: 4, 1>}, {transform_indices = @transform_6, window_bounds = array<i64: 1, 4, 256>}, {transform_indices = @transform_7, window_bounds = array<i64: 1, 4, 256>}]} {
    %c0 = arith.constant 0 : index
    %c0_0 = arith.constant 0 : index
    %0 = vector.load %arg4[%c0, %c0_0] : memref<4x4xf32, #tpu.memory_space<vmem>>, vector<4x4xf32>
    %c0_1 = arith.constant 0 : index
    %c0_2 = arith.constant 0 : index
    %c0_3 = arith.constant 0 : index
    %1 = vector.load %arg2[%c0_1, %c0_2, %c0_3] : memref<1x4x256xf32, #tpu.memory_space<vmem>>, vector<1x4x256xf32>
    %2 = vector.shape_cast %1 : vector<1x4x256xf32> to vector<4x256xf32>
    %cst = arith.constant dense<0.000000e+00> : vector<4x256xf32>
    %3 = tpu.matmul %0, %2, %cst {dimension_numbers = #tpu.dot_dimension_numbers<[1], [0], [0], [1], [0, 0, 1, 1], [], []>} : vector<4x4xf32>, vector<4x256xf32>, vector<4x256xf32> -> vector<4x256xf32>
    %c0_4 = arith.constant 0 : index
    %c0_5 = arith.constant 0 : index
    %4 = vector.load %arg5[%c0_4, %c0_5] : memref<4x1xf32, #tpu.memory_space<vmem>>, vector<4x1xf32>
    %5 = vector.broadcast %4 : vector<4x1xf32> to vector<4x256xf32>
    %6 = arith.addf %3, %5 : vector<4x256xf32>
    %c0_6 = arith.constant 0 : index
    %c0_7 = arith.constant 0 : index
    %7 = vector.load %arg6[%c0_6, %c0_7] : memref<4x4xf32, #tpu.memory_space<vmem>>, vector<4x4xf32>
    %c0_8 = arith.constant 0 : index
    %c0_9 = arith.constant 0 : index
    %c0_10 = arith.constant 0 : index
    %8 = vector.load %arg3[%c0_8, %c0_9, %c0_10] : memref<1x4x256xf32, #tpu.memory_space<vmem>>, vector<1x4x256xf32>
    %9 = vector.shape_cast %8 : vector<1x4x256xf32> to vector<4x256xf32>
    %cst_11 = arith.constant dense<0.000000e+00> : vector<4x256xf32>
    %10 = tpu.matmul %7, %9, %cst_11 {dimension_numbers = #tpu.dot_dimension_numbers<[1], [0], [0], [1], [0, 0, 1, 1], [], []>} : vector<4x4xf32>, vector<4x256xf32>, vector<4x256xf32> -> vector<4x256xf32>
    %c0_12 = arith.constant 0 : index
    %c0_13 = arith.constant 0 : index
    %11 = vector.load %arg7[%c0_12, %c0_13] : memref<4x1xf32, #tpu.memory_space<vmem>>, vector<4x1xf32>
    %12 = vector.broadcast %11 : vector<4x1xf32> to vector<4x256xf32>
    %13 = arith.addf %10, %12 : vector<4x256xf32>
    %cst_14 = arith.constant 0.000000e+00 : f32
    %14 = vector.broadcast %cst_14 : f32 to vector<4x256xf32>
    %15 = arith.maximumf %6, %14 : vector<4x256xf32>
    %c0_15 = arith.constant 0 : index
    %c0_16 = arith.constant 0 : index
    %c0_17 = arith.constant 0 : index
    %16 = vector.load %arg8[%c0_15, %c0_16, %c0_17] : memref<1x4x256xf32, #tpu.memory_space<vmem>>, vector<1x4x256xf32>
    %17 = vector.shape_cast %16 : vector<1x4x256xf32> to vector<4x256xf32>
    %18 = vector.shape_cast %15 : vector<4x256xf32> to vector<1x4x256xf32>
    tpu.vector_store %arg8[%c0_15, %c0_16, %c0_17], %18 {strides = array<i32>} : memref<1x4x256xf32, #tpu.memory_space<vmem>>, vector<1x4x256xf32>,
    %cst_18 = arith.constant 0.000000e+00 : f32
    %19 = vector.broadcast %cst_18 : f32 to vector<4x256xf32>
    %20 = arith.maximumf %13, %19 : vector<4x256xf32>
    %c0_19 = arith.constant 0 : index
    %c0_20 = arith.constant 0 : index
    %c0_21 = arith.constant 0 : index
    %21 = vector.load %arg9[%c0_19, %c0_20, %c0_21] : memref<1x4x256xf32, #tpu.memory_space<vmem>>, vector<1x4x256xf32>
    %22 = vector.shape_cast %21 : vector<1x4x256xf32> to vector<4x256xf32>
    %23 = vector.shape_cast %20 : vector<4x256xf32> to vector<1x4x256xf32>
    tpu.vector_store %arg9[%c0_19, %c0_20, %c0_21], %23 {strides = array<i32>} : memref<1x4x256xf32, #tpu.memory_space<vmem>>, vector<1x4x256xf32>,
    return
  }
  func.func @transform_0(%arg0: i32, %arg1: i32) -> (i32, i32, i32) {
    %c0_i32 = arith.constant 0 : i32
    %c0_i32_0 = arith.constant 0 : i32
    return %arg0, %c0_i32, %arg1 : i32, i32, i32
  }
  func.func @transform_1(%arg0: i32, %arg1: i32) -> (i32, i32, i32) {
    %c0_i32 = arith.constant 0 : i32
    %c0_i32_0 = arith.constant 0 : i32
    return %arg0, %c0_i32, %arg1 : i32, i32, i32
  }
  func.func @transform_2(%arg0: i32, %arg1: i32) -> (i32, i32) {
    %c0_i32 = arith.constant 0 : i32
    %c0_i32_0 = arith.constant 0 : i32
    %c0_i32_1 = arith.constant 0 : i32
    return %c0_i32, %c0_i32_0 : i32, i32
  }
  func.func @transform_3(%arg0: i32, %arg1: i32) -> (i32, i32) {
    %c0_i32 = arith.constant 0 : i32
    %c0_i32_0 = arith.constant 0 : i32
    %c0_i32_1 = arith.constant 0 : i32
    return %c0_i32, %c0_i32_0 : i32, i32
  }
  func.func @transform_4(%arg0: i32, %arg1: i32) -> (i32, i32) {
    %c0_i32 = arith.constant 0 : i32
    %c0_i32_0 = arith.constant 0 : i32
    %c0_i32_1 = arith.constant 0 : i32
    return %c0_i32, %c0_i32_0 : i32, i32
  }
  func.func @transform_5(%arg0: i32, %arg1: i32) -> (i32, i32) {
    %c0_i32 = arith.constant 0 : i32
    %c0_i32_0 = arith.constant 0 : i32
    %c0_i32_1 = arith.constant 0 : i32
    return %c0_i32, %c0_i32_0 : i32, i32
  }
  func.func @transform_6(%arg0: i32, %arg1: i32) -> (i32, i32, i32) {
    %c0_i32 = arith.constant 0 : i32
    %c0_i32_0 = arith.constant 0 : i32
    return %arg0, %c0_i32, %arg1 : i32, i32, i32
  }
  func.func @transform_7(%arg0: i32, %arg1: i32) -> (i32, i32, i32) {
    %c0_i32 = arith.constant 0 : i32
    %c0_i32_0 = arith.constant 0 : i32
    return %arg0, %c0_i32, %arg1 : i32, i32, i32
  }
}

module attributes {stable_mosaic.version = 11 : i64} {
  func.func @_ap_kernel_precomputed(%arg0: i32, %arg1: i32, %arg2: memref<1x4x256xf32, #tpu.memory_space<vmem>>, %arg3: memref<1x4x256xf32, #tpu.memory_space<vmem>>, %arg4: memref<4x4xf32, #tpu.memory_space<vmem>>, %arg5: memref<4x1xf32, #tpu.memory_space<vmem>>, %arg6: memref<4x4xf32, #tpu.memory_space<vmem>>, %arg7: memref<4x1xf32, #tpu.memory_space<vmem>>, %arg8: memref<1x4x256xf32, #tpu.memory_space<vmem>>, %arg9: memref<1x4x256xf32, #tpu.memory_space<vmem>>) attributes {dimension_semantics = [#tpu.dimension_semantics<parallel>, #tpu.dimension_semantics<parallel>], iteration_bounds = array<i64: 2, 1>, scalar_prefetch = 0 : i64, scratch_operands = 0 : i64, tpu.core_type = #tpu.core_type<tc>, window_params = [{transform_indices = @transform_0, window_bounds = array<i64: 1, 4, 256>}, {transform_indices = @transform_1, window_bounds = array<i64: 1, 4, 256>}, {pipeline_mode = #tpu.pipeline_mode<synchronous>, transform_indices = @transform_2, window_bounds = array<i64: 4, 4>}, {pipeline_mode = #tpu.pipeline_mode<synchronous>, transform_indices = @transform_3, window_bounds = array<i64: 4, 1>}, {pipeline_mode = #tpu.pipeline_mode<synchronous>, transform_indices = @transform_4, window_bounds = array<i64: 4, 4>}, {pipeline_mode = #tpu.pipeline_mode<synchronous>, transform_indices = @transform_5, window_bounds = array<i64: 4, 1>}, {transform_indices = @transform_6, window_bounds = array<i64: 1, 4, 256>}, {transform_indices = @transform_7, window_bounds = array<i64: 1, 4, 256>}]} {
    %c0 = arith.constant 0 : index
    %c0_0 = arith.constant 0 : index
    %0 = vector.load %arg4[%c0, %c0_0] : memref<4x4xf32, #tpu.memory_space<vmem>>, vector<4x4xf32>
    %c0_1 = arith.constant 0 : index
    %c0_2 = arith.constant 0 : index
    %c0_3 = arith.constant 0 : index
    %1 = vector.load %arg2[%c0_1, %c0_2, %c0_3] : memref<1x4x256xf32, #tpu.memory_space<vmem>>, vector<1x4x256xf32>
    %2 = vector.shape_cast %1 : vector<1x4x256xf32> to vector<4x256xf32>
    %cst = arith.constant dense<0.000000e+00> : vector<4x256xf32>
    %3 = tpu.matmul %0, %2, %cst {dimension_numbers = #tpu.dot_dimension_numbers<[1], [0], [0], [1], [0, 0, 1, 1], [], []>} : vector<4x4xf32>, vector<4x256xf32>, vector<4x256xf32> -> vector<4x256xf32>
    %c0_4 = arith.constant 0 : index
    %c0_5 = arith.constant 0 : index
    %4 = vector.load %arg5[%c0_4, %c0_5] : memref<4x1xf32, #tpu.memory_space<vmem>>, vector<4x1xf32>
    %5 = vector.broadcast %4 : vector<4x1xf32> to vector<4x256xf32>
    %6 = arith.addf %3, %5 : vector<4x256xf32>
    %cst_6 = arith.constant 0.000000e+00 : f32
    %7 = vector.broadcast %cst_6 : f32 to vector<4x256xf32>
    %8 = arith.maximumf %6, %7 : vector<4x256xf32>
    %c0_7 = arith.constant 0 : index
    %c0_8 = arith.constant 0 : index
    %9 = vector.load %arg6[%c0_7, %c0_8] : memref<4x4xf32, #tpu.memory_space<vmem>>, vector<4x4xf32>
    %c0_9 = arith.constant 0 : index
    %c0_10 = arith.constant 0 : index
    %c0_11 = arith.constant 0 : index
    %10 = vector.load %arg3[%c0_9, %c0_10, %c0_11] : memref<1x4x256xf32, #tpu.memory_space<vmem>>, vector<1x4x256xf32>
    %11 = vector.shape_cast %10 : vector<1x4x256xf32> to vector<4x256xf32>
    %cst_12 = arith.constant dense<0.000000e+00> : vector<4x256xf32>
    %12 = tpu.matmul %9, %11, %cst_12 {dimension_numbers = #tpu.dot_dimension_numbers<[1], [0], [0], [1], [0, 0, 1, 1], [], []>} : vector<4x4xf32>, vector<4x256xf32>, vector<4x256xf32> -> vector<4x256xf32>
    %c0_13 = arith.constant 0 : index
    %c0_14 = arith.constant 0 : index
    %13 = vector.load %arg7[%c0_13, %c0_14] : memref<4x1xf32, #tpu.memory_space<vmem>>, vector<4x1xf32>
    %14 = vector.broadcast %13 : vector<4x1xf32> to vector<4x256xf32>
    %15 = arith.addf %12, %14 : vector<4x256xf32>
    %cst_15 = arith.constant 0.000000e+00 : f32
    %16 = vector.broadcast %cst_15 : f32 to vector<4x256xf32>
    %17 = arith.maximumf %15, %16 : vector<4x256xf32>
    %18 = math.cos %17 : vector<4x256xf32>
    %19 = arith.mulf %8, %18 : vector<4x256xf32>
    %c0_16 = arith.constant 0 : index
    %c0_17 = arith.constant 0 : index
    %c0_18 = arith.constant 0 : index
    %20 = vector.load %arg8[%c0_16, %c0_17, %c0_18] : memref<1x4x256xf32, #tpu.memory_space<vmem>>, vector<1x4x256xf32>
    %21 = vector.shape_cast %20 : vector<1x4x256xf32> to vector<4x256xf32>
    %22 = vector.shape_cast %19 : vector<4x256xf32> to vector<1x4x256xf32>
    tpu.vector_store %arg8[%c0_16, %c0_17, %c0_18], %22 {strides = array<i32>} : memref<1x4x256xf32, #tpu.memory_space<vmem>>, vector<1x4x256xf32>,
    %23 = math.sin %17 : vector<4x256xf32>
    %24 = arith.mulf %8, %23 : vector<4x256xf32>
    %c0_19 = arith.constant 0 : index
    %c0_20 = arith.constant 0 : index
    %c0_21 = arith.constant 0 : index
    %25 = vector.load %arg9[%c0_19, %c0_20, %c0_21] : memref<1x4x256xf32, #tpu.memory_space<vmem>>, vector<1x4x256xf32>
    %26 = vector.shape_cast %25 : vector<1x4x256xf32> to vector<4x256xf32>
    %27 = vector.shape_cast %24 : vector<4x256xf32> to vector<1x4x256xf32>
    tpu.vector_store %arg9[%c0_19, %c0_20, %c0_21], %27 {strides = array<i32>} : memref<1x4x256xf32, #tpu.memory_space<vmem>>, vector<1x4x256xf32>,
    return
  }
  func.func @transform_0(%arg0: i32, %arg1: i32) -> (i32, i32, i32) {
    %c0_i32 = arith.constant 0 : i32
    %c0_i32_0 = arith.constant 0 : i32
    return %arg0, %c0_i32, %arg1 : i32, i32, i32
  }
  func.func @transform_1(%arg0: i32, %arg1: i32) -> (i32, i32, i32) {
    %c0_i32 = arith.constant 0 : i32
    %c0_i32_0 = arith.constant 0 : i32
    return %arg0, %c0_i32, %arg1 : i32, i32, i32
  }
  func.func @transform_2(%arg0: i32, %arg1: i32) -> (i32, i32) {
    %c0_i32 = arith.constant 0 : i32
    %c0_i32_0 = arith.constant 0 : i32
    %c0_i32_1 = arith.constant 0 : i32
    return %c0_i32, %c0_i32_0 : i32, i32
  }
  func.func @transform_3(%arg0: i32, %arg1: i32) -> (i32, i32) {
    %c0_i32 = arith.constant 0 : i32
    %c0_i32_0 = arith.constant 0 : i32
    %c0_i32_1 = arith.constant 0 : i32
    return %c0_i32, %c0_i32_0 : i32, i32
  }
  func.func @transform_4(%arg0: i32, %arg1: i32) -> (i32, i32) {
    %c0_i32 = arith.constant 0 : i32
    %c0_i32_0 = arith.constant 0 : i32
    %c0_i32_1 = arith.constant 0 : i32
    return %c0_i32, %c0_i32_0 : i32, i32
  }
  func.func @transform_5(%arg0: i32, %arg1: i32) -> (i32, i32) {
    %c0_i32 = arith.constant 0 : i32
    %c0_i32_0 = arith.constant 0 : i32
    %c0_i32_1 = arith.constant 0 : i32
    return %c0_i32, %c0_i32_0 : i32, i32
  }
  func.func @transform_6(%arg0: i32, %arg1: i32) -> (i32, i32, i32) {
    %c0_i32 = arith.constant 0 : i32
    %c0_i32_0 = arith.constant 0 : i32
    return %arg0, %c0_i32, %arg1 : i32, i32, i32
  }
  func.func @transform_7(%arg0: i32, %arg1: i32) -> (i32, i32, i32) {
    %c0_i32 = arith.constant 0 : i32
    %c0_i32_0 = arith.constant 0 : i32
    return %arg0, %c0_i32, %arg1 : i32, i32, i32
  }
}

</mosaic_0001>

<bundles_post_ra>
// kernel: tpu_custom_call.1
= control target key start
LH: loop header
LB: loop body
LE: loop exit
PB: predicated region body
PF: predicated region fallthrough
CT: control target
= control target key end

     0   :  { %7 = vsyncpa [#allocation3], 0  ;;  %s254_s0 = inlined_call_operand.hbm [shape: f32[8,128], index: 0, kind: input, shape index: {}]   ;;  %s255_s1 = inlined_call_operand.hbm [shape: f32[8,128], index: 1, kind: input, shape index: {}]   ;;  %s256_s2 = inlined_call_operand.hbm [shape: f32[8,128], index: 2, kind: output, shape index: {}]  }
   0x1   :  { %8 = vsyncpa [#allocation6], 0 }
   0x2   :  { %9 = vsyncpa [#allocation4], 0  ;;  %s15_s11 = sshll.u32 %s254_s0, 4  ;;  %s206_s12 = smov [#allocation2]   ;;  %s16_s11 = int_to_ptr.hbm [resolvable:$true] %s15_s11 }
   0x3   :  { %s17_s13 = sshll.u32 %s206_s12, 4  ;;  %s26_s16 = sshll.u32 %s255_s1, 4  ;;  %s18_s13 = int_to_ptr.vmem [resolvable:$true] %s17_s13  ;;  %s27_s16 = int_to_ptr.hbm [resolvable:$true] %s26_s16 }
   0x4   :  { %20 = dma.hbm_to_vmem [thread:$0]  %s16_s11, 128, %s18_s13, [#allocation3]  }
   0x5   :  { %s207_s17 = smov [#allocation5]  }
   0x6   :  { %s28_s18 = sshll.u32 %s207_s17, 4  ;;  %s29_s18 = int_to_ptr.vmem [resolvable:$true] %s28_s18 }
   0x7   :  { %31 = dma.hbm_to_vmem [thread:$0]  %s27_s16, 128, %s29_s18, [#allocation6]  }
   0x8   :  { %200 = dma.done.wait [#allocation3], 128  }
   0x9   :  { %201 = vsyncadd [#allocation3], 4294967168 }
   0xa   :  { %202 = dma.done.wait [#allocation6], 128  }
   0xb   :  { %203 = vsyncadd [#allocation6], 4294967168  ;;  %v232_v0 = vld [vmem:[#allocation2] sm:$0xff]  ;;  %v41_v1 = vld [vmem:[#allocation5] sm:$0xff]  ;;  %v208_v40 = vmov 0.0   ;;  %s210_s0 = smov [#allocation7]  }
   0xc   :  { %v42_v2 = vand.u32 2147483647, %v41_v1  ;;  %v43_v3 = vand.u32 2147483647, %v232_v0  ;;  %vm89_vm4 = vcmp.ne.f32.partialorder %v41_v1, %v41_v1  ;;  %vm90_vm5 = vcmp.ne.f32.partialorder %v232_v0, %v232_v0  ;;  %s108_s1 = sshll.u32 %s210_s0, 4  ;;  %s110_s21 = sshll.u32 %s256_s2, 4  ;;  %s109_s1 = int_to_ptr.vmem [resolvable:$true] %s108_s1  ;;  %s111_s21 = int_to_ptr.hbm [resolvable:$true] %s110_s21 }
   0xd   :  { %vm237_vm6 = vmor %vm89_vm4, %vm90_vm5  ;;  %vm85_vm11 = vcmp.lt.s32.totalorder %v41_v1, 0  ;;  %vm82_vm12 = vcmp.lt.f32.partialorder %v41_v1, 0.0  ;;  %vm87_vm13 = vcmp.eq.f32.partialorder %v232_v0, 0.0  ;;  %v209_v43 = vmov 0.7853982  }
   0xe   :  { %v45_v4 = vmax.f32 %v42_v2, %v43_v3  ;;  %v44_v12 = vmin.f32 %v42_v2, %v43_v3  ;;  %vm95_vm7 = vcmp.eq.s32.totalorder %v42_v2, inf  ;;  %vm96_vm8 = vcmp.eq.s32.totalorder %v43_v3, inf }
   0xf   :  { %vm241_vm9 = vmand %vm95_vm7, %vm96_vm8  ;;  %vm79_vm10 = vcmp.gt.f32.partialorder %v43_v3, %v42_v2  ;;  %v86_v41 = vsel %vm85_vm11, 3.1415927, %v208_v40  ;;  %v94_v44 = vsel %vm82_vm12, 2.3561945, %v209_v43  ;;  %v100_v47 = vand.u32 2147483648, %v232_v0 }
  0x10   :  { %126 = vrcp.f32 %v45_v4  ;;  %v57_v7 = vand.u32 2147483648, %v45_v4  ;;  %vm51_vm0 = vweird.f32 %v45_v4  ;;  %v55_v9 = vand.u32 2147483647, %v45_v4 }
  0x12   :  { %v58_v11 = vor.u32 1.1754944e-38, %v57_v7  ;;  %vm56_vm3 = vcmp.eq.f32.partialorder %v55_v9, 8.507059e+37 }
  0x16   :  { %v127_v5 = vpop.eup %126 }
  0x17   :  { %v47_v6 = vmul.f32 %v127_v5, %v45_v4  ;;  %vm52_vm1 = vweird.f32 %v127_v5 }
  0x18   :  { %vm53_vm2 = vmor %vm51_vm0, %vm52_vm1 }
  0x19   :  { %v48_v8 = vsub.f32 1.0, %v47_v6 }
  0x1b   :  { %v49_v10 = vmul.f32 %v127_v5, %v48_v8 }
  0x1d   :  { %v50_v13 = vadd.f32 %v127_v5, %v49_v10 }
  0x1f   :  { %v54_v14 = vsel %vm53_vm2, %v127_v5, %v50_v13 }
  0x20   :  { %v59_v15 = vsel %vm56_vm3, %v58_v11, %v54_v14 }
  0x21   :  { %v60_v16 = vmul.f32 %v59_v15, %v44_v12 }
  0x23   :  { %v61_v17 = vmul.f32 %v60_v16, %v60_v16 }
  0x25   :  { %v62_v18 = vmul.f32 0.002785687, %v61_v17 }
  0x27   :  { %v63_v19 = vadd.f32 -0.015866, %v62_v18 }
  0x29   :  { %v64_v20 = vmul.f32 %v63_v19, %v61_v17 }
  0x2b   :  { %v65_v21 = vadd.f32 0.04247222, %v64_v20 }
  0x2d   :  { %v66_v22 = vmul.f32 %v65_v21, %v61_v17 }
  0x2f   :  { %v67_v25 = vadd.f32 -0.074975304, %v66_v22 }
  0x31   :  { %v68_v26 = vmul.f32 %v67_v25, %v61_v17 }
  0x33   :  { %v69_v27 = vadd.f32 0.1064488, %v68_v26 }
  0x35   :  { %v70_v28 = vmul.f32 %v69_v27, %v61_v17 }
  0x37   :  { %v71_v29 = vadd.f32 -0.14207031, %v70_v28 }
  0x39   :  { %v72_v30 = vmul.f32 %v71_v29, %v61_v17 }
  0x3b   :  { %v73_v31 = vadd.f32 0.19993454, %v72_v30 }
  0x3d   :  { %v74_v32 = vmul.f32 %v73_v31, %v61_v17 }
  0x3f   :  { %v75_v33 = vadd.f32 -0.33333147, %v74_v32 }
  0x41   :  { %v76_v34 = vmul.f32 %v75_v33, %v61_v17 }
  0x43   :  { %v77_v35 = vmul.f32 %v76_v34, %v60_v16 }
  0x45   :  { %v78_v36 = vadd.f32 %v77_v35, %v60_v16 }
  0x47   :  { %v80_v37 = vsub.f32 1.5707964, %v78_v36 }
  0x49   :  { %v81_v38 = vsel %vm79_vm10, %v80_v37, %v78_v36 }
  0x4a   :  { %v83_v39 = vsub.f32 3.1415927, %v81_v38 }
  0x4c   :  { %v84_v42 = vsel %vm82_vm12, %v83_v39, %v81_v38 }
  0x4d   :  { %v88_v45 = vsel %vm87_vm13, %v86_v41, %v84_v42 }
  0x4e   :  { %v92_v46 = vsel %vm237_vm6, nan, %v88_v45 }
  0x4f   :  { %v98_v48 = vsel %vm241_vm9, %v94_v44, %v92_v46 }
  0x50   :  { %v99_v49 = vand.u32 2147483647, %v98_v48 }
  0x52   :  { %v101_v50 = vor.u32 %v100_v47, %v99_v49 }
  0x54   :  { %102 = vst [vmem:[#allocation7] sm:$0xff] %v101_v50 }
  0x55   :  { %113 = dma.vmem_to_hbm [thread:$0]  %s109_s1, 128, %s111_s21, [#allocation4]  }
  0x56   :  { %204 = dma.done.wait [#allocation4], 128  }
  0x57   :  { %205 = vsyncadd [#allocation4], 4294967168 }
  0x58   :  { %118 = vsyncpa [#allocation3], 1 }
  0x59   :  { %119 = vsyncpa [#allocation6], 1 }
  0x5a   :  { %120 = vsyncpa [#allocation4], 1 }

// kernel: conv_fre_branch.2
= control target key start
LH: loop header
LB: loop body
LE: loop exit
PB: predicated region body
PF: predicated region fallthrough
CT: control target
= control target key end

     0   :  { %s787_s24 = smov 0   ;;  %s789_s25 = smov 0   ;;  %s850_s0 = inlined_call_operand.vmem [shape: f32[2,4,256], index: 0, kind: input, shape index: {}]   ;;  %s851_s1 = inlined_call_operand.vmem [shape: f32[2,4,256], index: 1, kind: input, shape index: {}]   ;;  %s852_s2 = inlined_call_operand.vmem [shape: f32[4,4], index: 2, kind: input, shape index: {}]   ;;  %s853_s3 = inlined_call_operand.vmem [shape: f32[4,1], index: 3, kind: input, shape index: {}]   ;;  %s854_s4 = inlined_call_operand.vmem [shape: f32[4,4], index: 4, kind: input, shape index: {}]   ;;  %s855_s5 = inlined_call_operand.vmem [shape: f32[4,1], index: 5, kind: input, shape index: {}]   ;;  %s856_s6 = inlined_call_operand.vmem [shape: f32[2,4,256], index: 6, kind: output, shape index: {0}]   ;;  %s857_s7 = inlined_call_operand.vmem [shape: f32[2,4,256], index: 7, kind: output, shape index: {1}]  }
   0x1   :  { %s791_s26 = smov 0  }
   0x2 LB: > { %s30_s27 = sadd.s32 1, %s740_s25  ;;  %p673_p0 = scmp.ge.s32.totalorder %s744_s26, 1  ;;  %s744_s26 = sphi %s791_s26, %s18_s26   ;;  %s740_s25 = sphi %s789_s25, %s859_s25   ;;  %s736_s24 = sphi %s787_s24, %s858_s24  }
   0x3   : > { %p32_p1 = scmp.ge.s32.totalorder %s30_s27, 2  ;;  %p280_p2 = scmp.lt.s32.totalorder %s744_s26, 3 }
   0x5   : > { %s861_s27 = smov (%p32_p1, %s30_s27), 0  ;;  %p281_p3 = pnand %p673_p0, %p280_p2 }
   0x6   : > { %p339_p4 = scmp.lt.s32.totalorder (!%p281_p3), %s736_s24, 1 }
   0x7   : > { %284 = sbr.rel (%p281_p3) target bundleno = 173 (0xad), region = 44 }
   0xc   : > { %v746_v0 = vmov 0   ;;  %v380_v1 = vld [vmem:[%s853_s3] sm:$0xf]  ;;  %s863_s24 = smov (!%p339_p4, %s736_s24), 1  ;;  %vm394_vm0 = vcmask 1043456   ;;  %vm390_vm1 = vcmask 31744  }
   0xd   : > { %721 = vset.pattern.permute.xlu0 %v746_v0  ;;  %s808_s30 = sshll.u32 %s863_s24, 3  ;;  %v441_v3 = vld [vmem:[%s855_s5] sm:$0xf] }
   0xe   : > { %383 = vperm.xlu0 %721, %v380_v1   ;;  %s346_s10 = scalar_lea.vmem %s850_s0, %s808_s30  ;;  %s356_s15 = scalar_lea.vmem %s851_s1, %s808_s30  ;;  %v378_v5 = vld [vmem:[%s852_s2] sm:$0xf] }
   0xf   : > { %v379_v2 = vld [vmem:[%s346_s10] sm:$0xff]  ;;  %s366_s22 = scalar_lea.vmem %s856_s6, %s808_s30  ;;  %s376_s28 = scalar_lea.vmem %s857_s7, %s808_s30 }
  0x10   : > { %387 = vst [vmem:[#allocation1] ss:$2 sm:$0xff] %v379_v2  ;;  %v440_v4 = vld [vmem:[%s356_s15] sm:$0xff] }
  0x11   : > { %v439_v8 = vld [vmem:[%s854_s4] sm:$0xf] }
  0x16   : > { %444 = vperm.xlu0 %721, %v441_v3  }
  0x17   : > { %v389_v6 = vld.sshfl [vmem:[#allocation1 + $0x8] sm:$0xff pattern:$0x75316420]  ;;  %v388_v7 = vld.sshfl [vmem:[#allocation1] sm:$0xff pattern:$0x75316420] }
  0x18   : > { %684 = vmatpush.msk.msra.mxu1 %vm394_vm0, %v389_v6  ;;  %682 = vmatpush.msk.msra.mxu0 %vm394_vm0, %v388_v7  ;;  %448 = vst [vmem:[#allocation1] ss:$2 sm:$0xff] %v440_v4 }
  0x19   : > { %685 = vmatmul.msk.f32.vlgmr.msra.gmra.mxu1 %vm390_vm1, %v378_v5  ;;  %683 = vmatmul.msk.f32.vlgmr.msra.gmra.mxu0 %vm390_vm1, %v378_v5 }
  0x1f   : > { %v449_v9 = vld.sshfl [vmem:[#allocation1] sm:$0xff pattern:$0x75316420]  ;;  %v450_v10 = vld.sshfl [vmem:[#allocation1 + $0x8] sm:$0xff pattern:$0x75316420] }
  0x20   : > { %686 = vmatpush.msk.msra.mxu2 %vm394_vm0, %v449_v9  ;;  %688 = vmatpush.msk.msra.mxu3 %vm394_vm0, %v450_v10 }
  0x21   : > { %687 = vmatmul.msk.f32.vlgmr.msra.gmra.mxu2 %vm390_vm1, %v439_v8  ;;  %689 = vmatmul.msk.f32.vlgmr.msra.gmra.mxu3 %vm390_vm1, %v439_v8 }
  0x80   : > { %v384_v11 = vpop.permute.xlu0 %383 }
  0x88   : > { %v445_v20 = vpop.permute.xlu0 %444 }
  0x96   : > { %v436_v12 = vpop.f32.mrf.mxu1  ;;  %v416_v13 = vpop.f32.mrf.mxu0 }
  0x97   : > { %v437_v14 = vadd.f32 %v436_v12, %v384_v11  ;;  %v417_v15 = vadd.f32 %v416_v13, %v384_v11 }
  0x99   : > { %v499_v16 = vmax.f32 %v437_v14, 0.0  ;;  %v498_v17 = vmax.f32 %v417_v15, 0.0 }
  0x9b   : > { %v502_v18 = vrot.slane %v499_v16, 4 }
  0x9d   : > { %v503_v19 = vsel %vm394_vm0, %v498_v17, %v502_v18 }
  0x9e   : > { %505 = vst [vmem:[%s366_s22] sm:$0xff] %v503_v19 }
  0xa4   : > { %v475_v21 = vpop.f32.mrf.mxu2  ;;  %v495_v22 = vpop.f32.mrf.mxu3 }
  0xa5   : > { %v476_v23 = vadd.f32 %v475_v21, %v445_v20  ;;  %v496_v24 = vadd.f32 %v495_v22, %v445_v20 }
  0xa7   : > { %v507_v25 = vmax.f32 %v496_v24, 0.0  ;;  %v506_v26 = vmax.f32 %v476_v23, 0.0 }
  0xa9   : > { %v510_v27 = vrot.slane %v507_v25, 4 }
  0xab   : > { %v511_v28 = vsel %vm394_vm0, %v506_v26, %v510_v27 }
  0xac   : > { %513 = vst [vmem:[%s376_s28] sm:$0xff] %v511_v28 }
  0xad PF: > { %s18_s26 = sadd.s32 1, %s744_s26   ;;  %s858_s24 = smov %s740_s25 }
  0xae   : > { %p15_p5 = scmp.ge.s32.totalorder %s18_s26, 4   ;;  %s859_s25 = smov %s861_s27 }
  0xb0   :  { %17 = sbr.rel (!%p15_p5) target bundleno = 2 (0x2), region = 89 }

// kernel: conv_fre_branch.3
= control target key start
LH: loop header
LB: loop body
LE: loop exit
PB: predicated region body
PF: predicated region fallthrough
CT: control target
= control target key end

     0   :  { %s1433_s24 = smov 0   ;;  %s1435_s25 = smov 0   ;;  %s1676_s0 = inlined_call_operand.vmem [shape: f32[2,4,256], index: 0, kind: input, shape index: {}]   ;;  %s1677_s1 = inlined_call_operand.vmem [shape: f32[2,4,256], index: 1, kind: input, shape index: {}]   ;;  %s1678_s2 = inlined_call_operand.vmem [shape: f32[4,4], index: 2, kind: input, shape index: {}]   ;;  %s1679_s3 = inlined_call_operand.vmem [shape: f32[4,1], index: 3, kind: input, shape index: {}]   ;;  %s1680_s4 = inlined_call_operand.vmem [shape: f32[4,4], index: 4, kind: input, shape index: {}]   ;;  %s1681_s5 = inlined_call_operand.vmem [shape: f32[4,1], index: 5, kind: input, shape index: {}]   ;;  %s1682_s6 = inlined_call_operand.vmem [shape: f32[2,4,256], index: 6, kind: output, shape index: {0}]   ;;  %s1683_s7 = inlined_call_operand.vmem [shape: f32[2,4,256], index: 7, kind: output, shape index: {1}]  }
   0x1   :  { %s1437_s26 = smov 0  }
   0x2 LB: > { %s30_s27 = sadd.s32 1, %s1380_s25  ;;  %p1295_p0 = scmp.ge.s32.totalorder %s1384_s26, 1  ;;  %s1384_s26 = sphi %s1437_s26, %s18_s26   ;;  %s1380_s25 = sphi %s1435_s25, %s1689_s25   ;;  %s1376_s24 = sphi %s1433_s24, %s1688_s24  }
   0x3   : > { %p32_p1 = scmp.ge.s32.totalorder %s30_s27, 2  ;;  %p280_p2 = scmp.lt.s32.totalorder %s1384_s26, 3 }
   0x5   : > { %s1691_s27 = smov (%p32_p1, %s30_s27), 0  ;;  %p281_p3 = pnand %p1295_p0, %p280_p2 }
   0x6   : > { %p339_p4 = scmp.lt.s32.totalorder (!%p281_p3), %s1376_s24, 1 }
   0x7   : > { %284 = sbr.rel (%p281_p3) target bundleno = 289 (0x121), region = 44 }
   0xc   : > { %v1386_v0 = vmov 0   ;;  %v443_v1 = vld [vmem:[%s1681_s5] sm:$0xf]  ;;  %s1693_s24 = smov (!%p339_p4, %s1376_s24), 1  ;;  %vm394_vm0 = vcmask 1043456   ;;  %vm390_vm1 = vcmask 31744  }
   0xd   : > { %1361 = vset.pattern.permute.xlu0 %v1386_v0  ;;  %s1455_s30 = sshll.u32 %s1693_s24, 3  ;;  %v380_v3 = vld [vmem:[%s1679_s3] sm:$0xf]  ;;  %v1387_v41 = vmov 683565275  }
   0xe   : > { %446 = vperm.xlu0 %1361, %v443_v1   ;;  %s346_s10 = scalar_lea.vmem %s1676_s0, %s1455_s30  ;;  %s356_s15 = scalar_lea.vmem %s1677_s1, %s1455_s30  ;;  %v378_v5 = vld [vmem:[%s1678_s2] sm:$0xf]  ;;  %v1388_v43 = vmov 2475754826   ;;  %v1389_v47 = vmov 2131351028  }
   0xf   : > { %v379_v2 = vld [vmem:[%s346_s10] sm:$0xff]  ;;  %v1390_v50 = vmov 2102212464   ;;  %v1391_v53 = vmov 920167782   ;;  %s366_s22 = scalar_lea.vmem %s1682_s6, %s1455_s30  ;;  %s376_s28 = scalar_lea.vmem %s1683_s7, %s1455_s30 }
  0x10   : > { %387 = vst [vmem:[#allocation1] ss:$2 sm:$0xff] %v379_v2  ;;  %v442_v4 = vld [vmem:[%s356_s15] sm:$0xff]  ;;  %v1392_v56 = vmov 1326507024  }
  0x11   : > { %v441_v8 = vld [vmem:[%s1680_s4] sm:$0xf] }
  0x16   : > { %383 = vperm.xlu0 %1361, %v380_v3  }
  0x17   : > { %v388_v6 = vld.sshfl [vmem:[#allocation1] sm:$0xff pattern:$0x75316420]  ;;  %v389_v7 = vld.sshfl [vmem:[#allocation1 + $0x8] sm:$0xff pattern:$0x75316420] }
  0x18   : > { %450 = vst [vmem:[#allocation1] ss:$2 sm:$0xff] %v442_v4  ;;  %1304 = vmatpush.msk.msra.mxu0 %vm394_vm0, %v388_v6  ;;  %1306 = vmatpush.msk.msra.mxu1 %vm394_vm0, %v389_v7 }
  0x19   : > { %1305 = vmatmul.msk.f32.vlgmr.msra.gmra.mxu0 %vm390_vm1, %v378_v5  ;;  %1307 = vmatmul.msk.f32.vlgmr.msra.gmra.mxu1 %vm390_vm1, %v378_v5 }
  0x1f   : > { %v451_v9 = vld.sshfl [vmem:[#allocation1] sm:$0xff pattern:$0x75316420]  ;;  %v452_v10 = vld.sshfl [vmem:[#allocation1 + $0x8] sm:$0xff pattern:$0x75316420] }
  0x20   : > { %1308 = vmatpush.msk.msra.mxu2 %vm394_vm0, %v451_v9  ;;  %1310 = vmatpush.msk.msra.mxu3 %vm394_vm0, %v452_v10 }
  0x21   : > { %1309 = vmatmul.msk.f32.vlgmr.msra.gmra.mxu2 %vm390_vm1, %v441_v8  ;;  %1311 = vmatmul.msk.f32.vlgmr.msra.gmra.mxu3 %vm390_vm1, %v441_v8 }
  0x80   : > { %v447_v11 = vpop.permute.xlu0 %446 }
  0xa4   : > { %v477_v12 = vpop.f32.mrf.mxu2  ;;  %v497_v13 = vpop.f32.mrf.mxu3 }
  0xa5   : > { %v478_v14 = vadd.f32 %v477_v12, %v447_v11  ;;  %v498_v15 = vadd.f32 %v497_v13, %v447_v11 }
  0xa7   : > { %v1478_v16 = vmax.f32 %v478_v14, 0.0  ;;  %v1480_v17 = vmax.f32 %v498_v15, 0.0 }
  0xa9   : > { %v502_v18 = vand.u32 2147483647, %v1478_v16  ;;  %v505_v19 = vand.u32 2139095040, %v1478_v16  ;;  %v656_v20 = vand.u32 2147483647, %v1480_v17  ;;  %v659_v21 = vand.u32 2139095040, %v1480_v17 }
  0xab   : > { %v506_v22 = vshrl.u32 %v505_v19, 23  ;;  %v509_v23 = vand.u32 8388607, %v502_v18  ;;  %v660_v24 = vshrl.u32 %v659_v21, 23  ;;  %v663_v27 = vand.u32 8388607, %v656_v20 }
  0xad   : > { %v1312_v25 = vadd.s32 4294967169, %v506_v22  ;;  %v510_v26 = vor.u32 8388608, %v509_v23  ;;  %v1315_v28 = vadd.s32 4294967169, %v660_v24  ;;  %v664_v32 = vor.u32 8388608, %v663_v27 }
  0xaf   : > { %v512_v29 = vadd.s32 1, %v1312_v25  ;;  %v666_v30 = vadd.s32 1, %v1315_v28  ;;  %v1490_v31 = vshll.u32 %v510_v26, 8  ;;  %v1497_v39 = vshll.u32 %v664_v32, 8 }
  0xb1   : > { %vm513_vm2 = vcmp.gt.s32.totalorder %v512_v29, 0  ;;  %vm667_vm3 = vcmp.gt.s32.totalorder %v666_v30, 0  ;;  %v1493_v37 = vand.u32 65535, %v1490_v31  ;;  %v552_v45 = vshrl.u32 %v1490_v31, 16 }
  0xb2   : > { %v514_v33 = vsel %vm513_vm2, %v512_v29, 0  ;;  %v668_v35 = vsel %vm667_vm3, %v666_v30, 0 }
  0xb3   : > { %v516_v34 = vand.u32 31, %v514_v33  ;;  %v1495_v38 = vand.u32 31, %v668_v35  ;;  %v1499_v40 = vshrl.u32 %v514_v33, 5  ;;  %v1537_v25 = vshrl.u32 %v668_v35, 5 }
  0xb5   : > { %v517_v36 = vsub.s32 32, %v516_v34  ;;  %v519_v42 = vshll.u32 %v1387_v41, %v516_v34  ;;  %v522_v44 = vshll.u32 %v1388_v43, %v516_v34  ;;  %v525_v49 = vshll.u32 %v1389_v47, %v516_v34 }
  0xb6   : > { %v528_v52 = vshll.u32 %v1390_v50, %v516_v34  ;;  %v531_v55 = vshll.u32 %v1391_v53, %v516_v34  ;;  %v1509_v61 = vsub.s32 32, %v1495_v38  ;;  %vm534_vm4 = vcmp.lt.s32.totalorder %v1499_v40, 1 }
  0xb7   : > { %v520_v46 = vshrl.u32 %v1388_v43, %v517_v36  ;;  %v523_v48 = vshrl.u32 %v1389_v47, %v517_v36  ;;  %v526_v51 = vshrl.u32 %v1390_v50, %v517_v36  ;;  %v529_v54 = vshrl.u32 %v1391_v53, %v517_v36 }
  0xb8   : > { %v532_v57 = vshrl.u32 %v1392_v56, %v517_v36  ;;  %vm535_vm5 = vcmp.lt.s32.totalorder %v1499_v40, 2  ;;  %v518_v1 = vshrl.u32 %v1387_v41, %v517_v36  ;;  %vm537_vm6 = vcmp.lt.s32.totalorder %v1499_v40, 4 }
  0xb9   : > { %v521_v58 = vor.u32 %v520_v46, %v519_v42  ;;  %v524_v59 = vor.u32 %v523_v48, %v522_v44  ;;  %v527_v60 = vor.u32 %v526_v51, %v525_v49  ;;  %v530_v62 = vor.u32 %v529_v54, %v528_v52 }
  0xba   : > { %v533_v63 = vor.u32 %v532_v57, %v531_v55  ;;  %vm536_vm7 = vcmp.lt.s32.totalorder %v1499_v40, 3  ;;  %v673_v6 = vshll.u32 %v1387_v41, %v1495_v38  ;;  %v674_v10 = vshrl.u32 %v1388_v43, %v1509_v61 }
  0xbb   : > { %v542_v2 = vsel %vm534_vm4, %v521_v58, %v524_v59  ;;  %v546_v3 = vsel %vm534_vm4, %v524_v59, %v527_v60  ;;  %v543_v4 = vsel %vm537_vm6, %v530_v62, 920167782  ;;  %v539_v7 = vsel %vm537_vm6, %v527_v60, 2102212464 }
  0xbc   : > { %v547_v5 = vsel %vm537_vm6, %v533_v63, 1326507024  ;;  %v544_v8 = vsel %vm536_vm7, %v527_v60, %v543_v4  ;;  %v676_v13 = vshll.u32 %v1388_v43, %v1495_v38  ;;  %v677_v14 = vshrl.u32 %v1389_v47, %v1509_v61 }
  0xbd   : > { %v548_v9 = vsel %vm536_vm7, %v530_v62, %v547_v5  ;;  %v545_v11 = vsel %vm535_vm5, %v542_v2, %v544_v8  ;;  %v538_v23 = vsel %vm534_vm4, %v518_v1, %v521_v58  ;;  %v540_v24 = vsel %vm536_vm7, %v524_v59, %v539_v7 }
  0xbe   : > { %v549_v12 = vsel %vm535_vm5, %v546_v3, %v548_v9  ;;  %v575_v21 = vand.u32 65535, %v545_v11  ;;  %v576_v22 = vshrl.u32 %v545_v11, 16  ;;  %v1539_v26 = vor.u32 %v674_v10, %v673_v6 }
  0xbf   : > { %v553_v15 = vand.u32 65535, %v549_v12  ;;  %v554_v19 = vshrl.u32 %v549_v12, 16  ;;  %v1542_v29 = vor.u32 %v677_v14, %v676_v13  ;;  %v680_v30 = vshrl.u32 %v1390_v50, %v1509_v61 }
  0xc0   : > { %v578_v33 = vmul.u32 %v576_v22, %v1493_v37  ;;  %v579_v34 = vmul.u32 %v575_v21, %v552_v45  ;;  %v679_v36 = vshll.u32 %v1389_v47, %v1495_v38  ;;  %v577_v43 = vmul.u32 %v575_v21, %v1493_v37 }
  0xc1   : > { %v556_v27 = vmul.u32 %v554_v19, %v1493_v37  ;;  %v557_v28 = vmul.u32 %v553_v15, %v552_v45  ;;  %v555_v32 = vmul.u32 %v553_v15, %v1493_v37  ;;  %v558_v42 = vmul.u32 %v554_v19, %v552_v45 }
  0xc2   : > { %v580_v44 = vmul.u32 %v576_v22, %v552_v45  ;;  %v581_v51 = vshll.u32 %v578_v33, 16  ;;  %v583_v54 = vshll.u32 %v579_v34, 16  ;;  %v1550_v55 = vor.u32 %v680_v30, %v679_v36 }
  0xc3   : > { %v559_v35 = vshll.u32 %v556_v27, 16  ;;  %v560_v46 = vshrl.u32 %v556_v27, 16  ;;  %v561_v48 = vshll.u32 %v557_v28, 16  ;;  %v562_v49 = vshrl.u32 %v557_v28, 16 }
  0xc4   : > { %vm585_vm9 = vc.u32 %v577_v43, %v581_v51  ;;  %v587_v58 = vadd.s32 %v581_v51, %v577_v43  ;;  %v683_v47 = vshrl.u32 %v1391_v53, %v1509_v61  ;;  %v682_v45 = vshll.u32 %v1390_v50, %v1495_v38 }
  0xc5   : > { %vm563_vm8 = vc.u32 %v555_v32, %v559_v35  ;;  %v565_v52 = vadd.s32 %v559_v35, %v555_v32  ;;  %v586_v37 = vsel %vm585_vm9, 1, %v1386_v0  ;;  %v685_v63 = vshll.u32 %v1391_v53, %v1495_v38 }
  0xc6   : > { %v564_v57 = vsel %vm563_vm8, 1, %v1386_v0  ;;  %v588_v62 = vadd.s32 %v586_v37, %v580_v44  ;;  %vm589_vm11 = vc.u32 %v587_v58, %v583_v54  ;;  %v684_v3 = vor.u32 %v683_v47, %v682_v45 }
  0xc7   : > { %v566_v59 = vadd.s32 %v564_v57, %v558_v42  ;;  %vm567_vm10 = vc.u32 %v565_v52, %v561_v48  ;;  %v590_v2 = vsel %vm589_vm11, 1, %v1386_v0  ;;  %v686_v4 = vshrl.u32 %v1392_v56, %v1509_v61 }
  0xc8   : > { %v568_v60 = vsel %vm567_vm10, 1, %v1386_v0  ;;  %v582_v5 = vshrl.u32 %v578_v33, 16  ;;  %v584_v6 = vshrl.u32 %v579_v34, 16  ;;  %v1564_v7 = vadd.s32 %v587_v58, %v583_v54 }
  0xc9   : > { %v570_v1 = vadd.s32 %v568_v60, %v566_v59  ;;  %v592_v8 = vadd.s32 %v590_v2, %v588_v62  ;;  %v687_v9 = vor.u32 %v686_v4, %v685_v63  ;;  %vm688_vm12 = vcmp.lt.s32.totalorder %v1537_v25, 1 }
  0xca   : > { %vm691_vm13 = vcmp.lt.s32.totalorder %v1537_v25, 4  ;;  %vm690_vm14 = vcmp.lt.s32.totalorder %v1537_v25, 3  ;;  %v696_v38 = vsel %vm688_vm12, %v1539_v26, %v1542_v29  ;;  %vm689_vm15 = vcmp.lt.s32.totalorder %v1537_v25, 2 }
  0xcb   : > { %v571_v50 = vadd.s32 %v570_v1, %v560_v46  ;;  %v593_v10 = vadd.s32 %v592_v8, %v582_v5  ;;  %v697_v53 = vsel %vm691_vm13, %v684_v3, 920167782  ;;  %v700_v12 = vsel %vm688_vm12, %v1542_v29, %v1550_v55 }
  0xcc   : > { %v698_v11 = vsel %vm690_vm14, %v1550_v55, %v697_v53  ;;  %v541_v13 = vsel %vm535_vm5, %v538_v23, %v540_v24  ;;  %v701_v19 = vsel %vm691_vm13, %v687_v9, 1326507024  ;;  %v705_v22 = vand.u32 65535, %v1497_v39 }
  0xcd   : > { %v1575_v56 = vadd.s32 %v571_v50, %v562_v49  ;;  %v594_v14 = vadd.s32 %v593_v10, %v584_v6  ;;  %v699_v15 = vsel %vm689_vm15, %v696_v38, %v698_v11  ;;  %v702_v21 = vsel %vm690_vm14, %v684_v3, %v701_v19 }
  0xce   : > { %v729_v27 = vand.u32 65535, %v699_v15  ;;  %v703_v40 = vsel %vm689_vm15, %v700_v12, %v702_v21  ;;  %v706_v23 = vshrl.u32 %v1497_v39, 16  ;;  %v730_v24 = vshrl.u32 %v699_v15, 16 }
  0xcf   : > { %vm597_vm1 = vc.u32 %v1575_v56, %v1564_v7  ;;  %v598_v28 = vadd.s32 1, %v594_v14  ;;  %v595_v30 = vmul.u32 %v1490_v31, %v541_v13  ;;  %v707_v32 = vand.u32 65535, %v703_v40 }
  0xd0   : > { %v708_v33 = vshrl.u32 %v703_v40, 16  ;;  %v732_v36 = vmul.u32 %v730_v24, %v705_v22  ;;  %v733_v42 = vmul.u32 %v729_v27, %v706_v23  ;;  %v731_v46 = vmul.u32 %v729_v27, %v705_v22 }
  0xd1   : > { %v599_v34 = vsel %vm597_vm1, %v598_v28, %v594_v14  ;;  %v711_v44 = vmul.u32 %v707_v32, %v706_v23  ;;  %v734_v48 = vmul.u32 %v730_v24, %v706_v23  ;;  %v709_v52 = vmul.u32 %v707_v32, %v705_v22 }
  0xd2   : > { %v600_v35 = vadd.s32 %v599_v34, %v595_v30  ;;  %v710_v43 = vmul.u32 %v708_v33, %v705_v22  ;;  %v735_v49 = vshll.u32 %v732_v36, 16  ;;  %v712_v54 = vmul.u32 %v708_v33, %v706_v23 }
  0xd3   : > { %v715_v58 = vshll.u32 %v711_v44, 16  ;;  %v737_v47 = vshll.u32 %v733_v42, 16  ;;  %v693_v2 = vsel %vm691_vm13, %v1550_v55, 2102212464  ;;  %v672_v6 = vshrl.u32 %v1387_v41, %v1509_v61 }
  0xd4   : > { %v601_v51 = vadd.s32 536870912, %v600_v35  ;;  %v713_v57 = vshll.u32 %v710_v43, 16  ;;  %vm739_vm2 = vc.u32 %v731_v46, %v735_v49  ;;  %v741_v59 = vadd.s32 %v735_v49, %v731_v46 }
  0xd5   : > { %v740_v45 = vsel %vm739_vm2, 1, %v1386_v0  ;;  %v714_v9 = vshrl.u32 %v710_v43, 16  ;;  %v736_v10 = vshrl.u32 %v732_v36, 16  ;;  %v692_v53 = vsel %vm688_vm12, %v672_v6, %v1539_v26 }
  0xd6   : > { %v1600_v31 = vshrl.u32 %v601_v51, 30  ;;  %vm717_vm3 = vc.u32 %v709_v52, %v713_v57  ;;  %v719_v37 = vadd.s32 %v713_v57, %v709_v52  ;;  %v742_v62 = vadd.s32 %v740_v45, %v734_v48 }
  0xd7   : > { %v718_v60 = vsel %vm717_vm3, 1, %v1386_v0  ;;  %vm743_vm4 = vc.u32 %v741_v59, %v737_v47  ;;  %v694_v55 = vsel %vm690_vm14, %v1542_v29, %v693_v2  ;;  %v716_v11 = vshrl.u32 %v711_v44, 16 }
  0xd8   : > { %v603_v63 = vshll.u32 %v1600_v31, 30  ;;  %v720_v1 = vadd.s32 %v718_v60, %v712_v54  ;;  %vm721_vm5 = vc.u32 %v719_v37, %v715_v58  ;;  %v744_v4 = vsel %vm743_vm4, 1, %v1386_v0 }
  0xd9   : > { %v722_v3 = vsel %vm721_vm5, 1, %v1386_v0  ;;  %v746_v50 = vadd.s32 %v744_v4, %v742_v62  ;;  %v738_v12 = vshrl.u32 %v733_v42, 16  ;;  %v695_v19 = vsel %vm689_vm15, %v692_v53, %v694_v55 }
  0xda   : > { %v604_v5 = vsub.s32 %v600_v35, %v603_v63  ;;  %v724_v8 = vadd.s32 %v722_v3, %v720_v1  ;;  %v745_v21 = vadd.s32 %v741_v59, %v737_v47  ;;  %v749_v26 = vmul.u32 %v1497_v39, %v695_v19 }
  0xdb   : > { %v747_v13 = vadd.s32 %v746_v50, %v736_v10  ;;  %v596_v40 = vadd.s32 %v1564_v7, %v1575_v56  ;;  %vm504_vm10 = vcmp.lt.s32.totalorder %v1478_v16, 0  ;;  %vm1626_vm11 = vcmp.le.f32.partialorder %v502_v18, 0.7853982 }
  0xdc   : > { %vm605_vm6 = vcmp.lt.s32.totalorder %v604_v5, 0  ;;  %v606_v38 = vsub.s32 0, %v604_v5  ;;  %v725_v0 = vadd.s32 %v724_v8, %v714_v9  ;;  %v626_v53 = vsub.s32 4, %v1600_v31 }
  0xdd   : > { %v748_v15 = vadd.s32 %v747_v13, %v738_v12  ;;  %vm1638_vm13 = vcmp.le.f32.partialorder %v656_v20, 0.7853982  ;;  %vm658_vm14 = vcmp.lt.s32.totalorder %v1480_v17, 0 }
  0xde   : > { %v607_v14 = vsel %vm605_vm6, %v606_v38, %v604_v5  ;;  %v726_v61 = vadd.s32 %v725_v0, %v716_v11 }
  0xdf   : > { %v608_v41 = vclz %v607_v14  ;;  %v752_v27 = vadd.s32 1, %v748_v15  ;;  %v627_v14 = vsel %vm504_vm10, %v626_v53, %v1600_v31 }
  0xe0   : > { %vm751_vm7 = vc.u32 %v726_v61, %v745_v21  ;;  %v750_v60 = vadd.s32 %v745_v21, %v726_v61  ;;  %v629_v20 = vsel %vm1626_vm11, 0, %v627_v14 }
  0xe1   : > { %v1313_v22 = vadd.s32 4294967294, %v608_v41  ;;  %v753_v29 = vsel %vm751_vm7, %v752_v27, %v748_v15 }
  0xe2   : > { %v754_v30 = vadd.s32 %v753_v29, %v749_v26 }
  0xe3   : > { %vm1314_vm8 = vcmp.lt.s32.totalorder %v1313_v22, 0 }
  0xe4   : > { %v611_v28 = vsel %vm1314_vm8, 0, %v1313_v22  ;;  %v755_v25 = vadd.s32 536870912, %v754_v30 }
  0xe5   : > { %v612_v23 = vsub.s32 32, %v611_v28  ;;  %v616_v24 = vsub.s32 4294967266, %v611_v28  ;;  %v613_v32 = vshll.u32 %v604_v5, %v611_v28 }
  0xe6   : > { %v756_v35 = vshrl.u32 %v755_v25, 30 }
  0xe7   : > { %v614_v33 = vshrl.u32 %v596_v40, %v612_v23  ;;  %v617_v34 = vadd.s32 127, %v616_v24  ;;  %v384_v40 = vpop.permute.xlu0 %383  ;;  %v436_v23 = vpop.f32.mrf.mxu1 }
  0xe8   : > { %v757_v44 = vshll.u32 %v756_v35, 30  ;;  %v780_v15 = vsub.s32 4, %v756_v35 }
  0xe9   : > { %v615_v36 = vor.u32 %v614_v33, %v613_v32  ;;  %v618_v42 = vshll.u32 %v617_v34, 23  ;;  %v962_v32 = vadd.s32 3, %v629_v20 }
  0xea   : > { %v758_v39 = vsub.s32 %v754_v30, %v757_v44  ;;  %v781_v26 = vsel %vm658_vm14, %v780_v15, %v756_v35  ;;  %v416_v44 = vpop.f32.mrf.mxu0 }
  0xeb   : > { %v619_v43 = vor.u32 4788187, %v618_v42  ;;  %v622_v48 = vcvt.s32.f32 %v615_v36  ;;  %v783_v33 = vsel %vm1638_vm13, 0, %v781_v26  ;;  %v437_v42 = vadd.f32 %v436_v23, %v384_v40 }
  0xec   : > { %vm759_vm9 = vcmp.lt.s32.totalorder %v758_v39, 0  ;;  %v760_v51 = vsub.s32 0, %v758_v39 }
  0xed   : > { %v620_v46 = vand.u32 2147483647, %v619_v43  ;;  %v646_v43 = vand.u32 3, %v629_v20  ;;  %v440_v54 = vmax.f32 %v437_v42, 0.0 }
  0xee   : > { %v761_v7 = vsel %vm759_vm9, %v760_v51, %v758_v39 }
  0xef   : > { %v623_v49 = vmul.f32 %v622_v48, %v620_v46  ;;  %v762_v56 = vclz %v761_v7  ;;  %vm647_vm15 = vcmp.lt.s32.totalorder %v646_v43, 2  ;;  %vm648_vm1 = vcmp.eq.s32.totalorder %v646_v43, 0 }
  0xf0   : > { %vm651_vm2 = vcmp.eq.s32.totalorder %v646_v43, 2 }
  0xf1   : > { %v624_v52 = vxor.u32 2147483648, %v623_v49  ;;  %v1316_v47 = vadd.s32 4294967294, %v762_v56  ;;  %v417_v56 = vadd.f32 %v416_v44, %v384_v40 }
  0xf3   : > { %v625_v57 = vsel %vm504_vm10, %v624_v52, %v623_v49  ;;  %vm1317_vm12 = vcmp.lt.s32.totalorder %v1316_v47, 0  ;;  %v963_v49 = vand.u32 3, %v962_v32 }
  0xf4   : > { %v628_v58 = vsel %vm1626_vm11, %v1478_v16, %v625_v57  ;;  %v765_v45 = vsel %vm1317_vm12, 0, %v1316_v47  ;;  %v800_v57 = vand.u32 3, %v783_v33  ;;  %vm645_vm12 = vweird.f32 %v1478_v16 }
  0xf5   : > { %v630_v59 = vmul.f32 %v628_v58, %v628_v58  ;;  %v766_v62 = vsub.s32 32, %v765_v45  ;;  %v770_v63 = vsub.s32 4294967266, %v765_v45  ;;  %v767_v18 = vshll.u32 %v758_v39, %v765_v45 }
  0xf6   : > { %v1117_v39 = vadd.s32 3, %v783_v33  ;;  %vm964_vm3 = vcmp.lt.s32.totalorder %v963_v49, 2  ;;  %vm965_vm4 = vcmp.eq.s32.totalorder %v963_v49, 0  ;;  %vm968_vm5 = vcmp.eq.s32.totalorder %v963_v49, 2 }
  0xf7   : > { %v638_v37 = vmul.f32 -0.00019511016, %v630_v59  ;;  %v768_v2 = vshrl.u32 %v750_v60, %v766_v62  ;;  %v771_v3 = vadd.s32 127, %v770_v63  ;;  %v631_v4 = vmul.f32 -0.001358992, %v630_v59 }
  0xf8   : > { %vm801_vm6 = vcmp.lt.s32.totalorder %v800_v57, 2  ;;  %vm802_vm7 = vcmp.eq.s32.totalorder %v800_v57, 0  ;;  %vm805_vm8 = vcmp.eq.s32.totalorder %v800_v57, 2 }
  0xf9   : > { %v639_v1 = vadd.f32 0.008332121, %v638_v37  ;;  %v769_v5 = vor.u32 %v768_v2, %v767_v18  ;;  %v772_v6 = vshll.u32 %v771_v3, 23  ;;  %v632_v9 = vadd.f32 0.041655596, %v631_v4 }
  0xfa   : > { %v1118_v37 = vand.u32 3, %v1117_v39 }
  0xfb   : > { %v640_v8 = vmul.f32 %v639_v1, %v630_v59  ;;  %v773_v50 = vor.u32 4788187, %v772_v6  ;;  %v776_v38 = vcvt.s32.f32 %v769_v5  ;;  %v633_v0 = vmul.f32 %v632_v9, %v630_v59 }
  0xfc   : > { %vm1119_vm9 = vcmp.lt.s32.totalorder %v1118_v37, 2  ;;  %vm1120_vm10 = vcmp.eq.s32.totalorder %v1118_v37, 0  ;;  %vm1123_vm11 = vcmp.eq.s32.totalorder %v1118_v37, 2 }
  0xfd   : > { %v774_v10 = vand.u32 2147483647, %v773_v50  ;;  %v641_v55 = vadd.f32 -0.16666654, %v640_v8  ;;  %v634_v21 = vadd.f32 -0.4999988, %v633_v0 }
  0xfe   : > { %v439_v0 = vmax.f32 %v417_v56, 0.0 }
  0xff   : > { %v777_v11 = vmul.f32 %v776_v38, %v774_v10  ;;  %v642_v41 = vmul.f32 %v641_v55, %v630_v59  ;;  %v635_v24 = vmul.f32 %v634_v21, %v630_v59 }
 0x101   : > { %v778_v12 = vxor.u32 2147483648, %v777_v11  ;;  %v643_v27 = vadd.f32 1.0, %v642_v41  ;;  %v636_v46 = vadd.f32 1.0, %v635_v24 }
 0x103   : > { %v779_v61 = vsel %vm658_vm14, %v778_v12, %v777_v11  ;;  %v644_v34 = vmul.f32 %v643_v27, %v628_v58  ;;  %v652_v47 = vxor.u32 2147483648, %v636_v46 }
 0x104   : > { %v782_v19 = vsel %vm1638_vm13, %v1480_v17, %v779_v61  ;;  %vm799_vm13 = vweird.f32 %v1480_v17 }
 0x105   : > { %v784_v22 = vmul.f32 %v782_v19, %v782_v19  ;;  %v649_v51 = vxor.u32 2147483648, %v644_v34  ;;  %v653_v1 = vsel %vm651_vm2, %v652_v47, %v644_v34  ;;  %v970_v18 = vsel %vm968_vm5, %v652_v47, %v644_v34 }
 0x107   : > { %v785_v28 = vmul.f32 -0.001358992, %v784_v22  ;;  %v792_v29 = vmul.f32 -0.00019511016, %v784_v22  ;;  %v650_v45 = vsel %vm648_vm1, %v636_v46, %v649_v51  ;;  %v967_v60 = vsel %vm965_vm4, %v636_v46, %v649_v51 }
 0x108   : > { %v654_v3 = vsel %vm647_vm15, %v650_v45, %v653_v1  ;;  %v971_v4 = vsel %vm964_vm3, %v967_v60, %v970_v18 }
 0x109   : > { %v786_v31 = vadd.f32 0.041655596, %v785_v28  ;;  %v793_v30 = vadd.f32 0.008332121, %v792_v29  ;;  %v655_v38 = vsel %vm645_vm12, nan, %v654_v3  ;;  %v972_v53 = vsel %vm645_vm12, nan, %v971_v4 }
 0x10a   : > { %v810_v14 = vmul.f32 %v655_v38, %v439_v0  ;;  %v1128_v41 = vmul.f32 %v972_v53, %v439_v0 }
 0x10b   : > { %v787_v25 = vmul.f32 %v786_v31, %v784_v22  ;;  %v794_v36 = vmul.f32 %v793_v30, %v784_v22 }
 0x10d   : > { %v788_v48 = vadd.f32 -0.4999988, %v787_v25  ;;  %v795_v35 = vadd.f32 -0.16666654, %v794_v36 }
 0x10f   : > { %v789_v52 = vmul.f32 %v788_v48, %v784_v22  ;;  %v796_v7 = vmul.f32 %v795_v35, %v784_v22 }
 0x111   : > { %v790_v59 = vadd.f32 1.0, %v789_v52  ;;  %v797_v58 = vadd.f32 1.0, %v796_v7 }
 0x113   : > { %v798_v62 = vmul.f32 %v797_v58, %v782_v19  ;;  %v806_v63 = vxor.u32 2147483648, %v790_v59 }
 0x115   : > { %v803_v2 = vxor.u32 2147483648, %v798_v62  ;;  %v807_v6 = vsel %vm805_vm8, %v806_v63, %v798_v62  ;;  %v1125_v50 = vsel %vm1123_vm11, %v806_v63, %v798_v62 }
 0x117   : > { %v804_v5 = vsel %vm802_vm7, %v790_v59, %v803_v2  ;;  %v1122_v8 = vsel %vm1120_vm10, %v790_v59, %v803_v2 }
 0x118   : > { %v808_v9 = vsel %vm801_vm6, %v804_v5, %v807_v6  ;;  %v1126_v10 = vsel %vm1119_vm9, %v1122_v8, %v1125_v50 }
 0x119   : > { %v809_v55 = vsel %vm799_vm13, nan, %v808_v9  ;;  %v1127_v11 = vsel %vm799_vm13, nan, %v1126_v10 }
 0x11a   : > { %v811_v12 = vmul.f32 %v809_v55, %v440_v54  ;;  %v1129_v13 = vmul.f32 %v1127_v11, %v440_v54 }
 0x11c   : > { %v814_v16 = vrot.slane %v811_v12, 4  ;;  %v1132_v61 = vrot.slane %v1129_v13, 4 }
 0x11e   : > { %v815_v17 = vsel %vm394_vm0, %v810_v14, %v814_v16  ;;  %v1133_v15 = vsel %vm394_vm0, %v1128_v41, %v1132_v61 }
 0x11f   : > { %817 = vst [vmem:[%s366_s22] sm:$0xff] %v815_v17 }
 0x120   : > { %1135 = vst [vmem:[%s376_s28] sm:$0xff] %v1133_v15 }
 0x121 PF: > { %s18_s26 = sadd.s32 1, %s1384_s26   ;;  %s1688_s24 = smov %s1380_s25 }
 0x122   : > { %p15_p5 = scmp.ge.s32.totalorder %s18_s26, 4   ;;  %s1689_s25 = smov %s1691_s27 }
 0x124   :  { %17 = sbr.rel (!%p15_p5) target bundleno = 2 (0x2), region = 89 }

</bundles_post_ra>
